<compile_context>
chip_gen: v7x
topology: tpu7x:2x2x1
jax: 0.10.0
libtpu: 0.0.40
codegen_flags: <defaults>
</compile_context>

<pallas_src>
import functools

import jax
import jax.numpy as jnp
from jax.experimental import pallas as pl
from jax.experimental.pallas import tpu as pltpu


_LANE = 128                              # lane width (last dim granularity)
_INPUT_BLOCK_BYTES = 8 * 1024 * 1024     # ~8 MiB per input buffer target
_VMEM_LIMIT_BYTES = 32 * 1024 * 1024     # explicit scoped-VMEM budget


def _max_identity(dtype):
    """Identity element for a max reduction in `dtype`."""
    if jnp.issubdtype(dtype, jnp.floating):
        return jnp.array(-jnp.inf, dtype)
    if jnp.issubdtype(dtype, jnp.integer):
        return jnp.array(jnp.iinfo(dtype).min, dtype)
    if dtype == jnp.bool_:
        return jnp.array(False, dtype)
    raise ValueError(f"unsupported dtype for max pooling: {dtype}")


def _global_max_pool1d_kernel(x_ref, o_ref, *, c, tc):
    # x_ref: (TB, TC, TL) input block; o_ref: (TB, TL) output block.
    # Channel is the last grid axis; the output block index does not depend
    # on it, so o_ref stays resident in VMEM and is the max accumulator.
    k = pl.program_id(2)
    x = x_ref[...]

    if c % tc != 0:
        # Ragged reduction axis: mask the out-of-bounds channel tail with the
        # max identity.  `valid` is tc on full steps, c % tc on the last one.
        # (Compute is fully hidden behind the DMA, so this select is free.)
        valid = jnp.minimum(c - k * tc, tc)
        ch = jax.lax.broadcasted_iota(jnp.int32, x.shape, 1)
        x = jnp.where(ch < valid, x, _max_identity(x.dtype))

    partial = jnp.max(x, axis=1)                      # (TB, TL)

    @pl.when(k == 0)
    def _init():
        o_ref[...] = partial

    @pl.when(k != 0)
    def _accumulate():
        o_ref[...] = jnp.maximum(o_ref[...], partial)


def global_max_pool1d(x: jax.Array, *, tb=None, tc=None, tl=None) -> jax.Array:
    """Pallas equivalent of `torch.max(x, 1).values` for a 3-D NCL input."""
    n, c, l = x.shape
    dtype = x.dtype
    itemsize = jnp.dtype(dtype).itemsize
    packing = max(1, 4 // itemsize)       # sub-32-bit dtypes pack on sublanes
    sub = 8 * packing                     # sublane granularity for this dtype

    # ---- dtype-aware tile selection (full-dim blocks are always legal) -----
    if tb is None:
        tb = n if n <= sub else sub                        # output sublane-dense
    if tc is None:
        tc = c if c <= _LANE else _LANE                    # mult. of `sub`
    if tl is None:
        # Lane-dense length tile sized so the input block is ~8 MiB.
        tl_cap = max(_LANE, ((_INPUT_BLOCK_BYTES // (tb * tc * itemsize))
                             // _LANE) * _LANE)
        tl = l if l <= tl_cap else tl_cap
        # v7x has 2 TensorCores: keep >= 2 programs on the parallel axes when
        # L allows it (no-op cost elsewhere: one extra ~0.35us grid step).
        if pl.cdiv(n, tb) * pl.cdiv(l, tl) < 2 and l >= 2 * _LANE:
            tl = _LANE * pl.cdiv(pl.cdiv(l, 2), _LANE)

    grid = (pl.cdiv(n, tb), pl.cdiv(l, tl), pl.cdiv(c, tc))  # reduction last

    cost = pl.CostEstimate(
        flops=int(n) * int(c) * int(l),
        transcendentals=0,
        bytes_accessed=(int(n) * int(c) * int(l) + int(n) * int(l)) * itemsize,
    )

    kernel = functools.partial(_global_max_pool1d_kernel, c=c, tc=tc)

    return pl.pallas_call(
        kernel,
        out_shape=jax.ShapeDtypeStruct((n, l), dtype),
        grid_spec=pltpu.PrefetchScalarGridSpec(
            num_scalar_prefetch=0,
            grid=grid,
            # input (N, C, L): block indices (batch b, channel k, length j)
            in_specs=[pl.BlockSpec((tb, tc, tl), lambda b, j, k: (b, k, j))],
            # output block independent of k -> VMEM-resident accumulator
            out_specs=pl.BlockSpec((tb, tl), lambda b, j, k: (b, j)),
        ),
        compiler_params=pltpu.CompilerParams(
            dimension_semantics=("parallel", "parallel", "arbitrary"),
            vmem_limit_bytes=_VMEM_LIMIT_BYTES,
        ),
        cost_estimate=cost,
    )(x)


if __name__ == "__main__":
    key = jax.random.PRNGKey(0)

    # Primary case: small NCL input (batch=2, channels=4, length=16).
    # Full-dim blocks, single grid step, no masking.
    x = jax.random.normal(key, (2, 4, 16), dtype=jnp.float32)
    out = jax.block_until_ready(global_max_pool1d(x))
    ref = jnp.max(x, axis=1)
    assert out.shape == ref.shape == (2, 16)
    assert jnp.allclose(out, ref), "mismatch vs reference (small case)"

    # Secondary case: exercises the ragged (unpadded) path with tiny tile
    # overrides: grid = (1, 3, 3); ragged C (20 % 8 = 4 -> in-kernel mask)
    # and ragged L (300 % 128 -> discarded edge columns).
    x2 = jax.random.normal(jax.random.PRNGKey(0), (3, 20, 300), dtype=jnp.float32)
    out2 = jax.block_until_ready(global_max_pool1d(x2, tc=8, tl=128))
    ref2 = jnp.max(x2, axis=1)
    assert out2.shape == ref2.shape == (3, 300)
    assert jnp.allclose(out2, ref2), "mismatch vs reference (ragged tiled case)"

    # Third case: bf16 path (dtype-aware sublane packing), default tiles.
    x3 = jax.random.normal(jax.random.PRNGKey(1), (2, 6, 32), dtype=jnp.bfloat16)
    out3 = jax.block_until_ready(global_max_pool1d(x3))
    ref3 = jnp.max(x3, axis=1)
    assert out3.shape == ref3.shape == (2, 32)
    assert jnp.array_equal(out3, ref3), "mismatch vs reference (bf16 case)"

    print("KERNEL_OK")
</pallas_src>

<mosaic_0001>
module attributes {stable_mosaic.version = 11 : i64} {
  func.func @_global_max_pool1d_kernel(%arg0: i32, %arg1: i32, %arg2: i32, %arg3: memref<2x4x16xf32, #tpu.memory_space<vmem>>, %arg4: memref<2x16xf32, #tpu.memory_space<vmem>>) attributes {dimension_semantics = [#tpu.dimension_semantics<parallel>, #tpu.dimension_semantics<parallel>, #tpu.dimension_semantics<arbitrary>], iteration_bounds = array<i64: 1, 1, 1>, scalar_prefetch = 0 : i64, scratch_operands = 0 : i64, tpu.core_type = #tpu.core_type<tc>, window_params = [{transform_indices = @transform_0, window_bounds = array<i64: 2, 4, 16>}, {transform_indices = @transform_1, window_bounds = array<i64: 2, 16>}]} {
    %c0 = arith.constant 0 : index
    %c0_0 = arith.constant 0 : index
    %c0_1 = arith.constant 0 : index
    %0 = vector.load %arg3[%c0, %c0_0, %c0_1] : memref<2x4x16xf32, #tpu.memory_space<vmem>>, vector<2x4x16xf32>
    %cst = arith.constant dense<0xFF800000> : vector<2x16xf32>
    %1 = vector.multi_reduction <maximumf>, %0, %cst [1] : vector<2x4x16xf32> to vector<2x16xf32>
    %c0_i32 = arith.constant 0 : i32
    %2 = arith.cmpi eq, %arg2, %c0_i32 : i32
    %3 = arith.extui %2 : i1 to i32
    %c0_i32_2 = arith.constant 0 : i32
    %4 = arith.cmpi ne, %3, %c0_i32_2 : i32
    scf.if %4 {
      %c0_5 = arith.constant 0 : index
      %c0_6 = arith.constant 0 : index
      %8 = vector.load %arg4[%c0_5, %c0_6] : memref<2x16xf32, #tpu.memory_space<vmem>>, vector<2x16xf32>
      tpu.vector_store %arg4[%c0_5, %c0_6], %1 {strides = array<i32>} : memref<2x16xf32, #tpu.memory_space<vmem>>, vector<2x16xf32>,
    } else {
    }
    %c0_i32_3 = arith.constant 0 : i32
    %5 = arith.cmpi ne, %arg2, %c0_i32_3 : i32
    %6 = arith.extui %5 : i1 to i32
    %c0_i32_4 = arith.constant 0 : i32
    %7 = arith.cmpi ne, %6, %c0_i32_4 : i32
    scf.if %7 {
      %c0_5 = arith.constant 0 : index
      %c0_6 = arith.constant 0 : index
      %8 = vector.load %arg4[%c0_5, %c0_6] : memref<2x16xf32, #tpu.memory_space<vmem>>, vector<2x16xf32>
      %9 = arith.maximumf %8, %1 : vector<2x16xf32>
      %c0_7 = arith.constant 0 : index
      %c0_8 = arith.constant 0 : index
      %10 = vector.load %arg4[%c0_7, %c0_8] : memref<2x16xf32, #tpu.memory_space<vmem>>, vector<2x16xf32>
      tpu.vector_store %arg4[%c0_7, %c0_8], %9 {strides = array<i32>} : memref<2x16xf32, #tpu.memory_space<vmem>>, vector<2x16xf32>,
    } else {
    }
    return
  }
  func.func @transform_0(%arg0: i32, %arg1: i32, %arg2: i32) -> (i32, i32, i32) {
    %c0_i32 = arith.constant 0 : i32
    return %arg0, %arg2, %arg1 : i32, i32, i32
  }
  func.func @transform_1(%arg0: i32, %arg1: i32, %arg2: i32) -> (i32, i32) {
    %c0_i32 = arith.constant 0 : i32
    return %arg0, %arg1 : i32, i32
  }
}

</mosaic_0001>

<bundles_post_ra>
// kernel: tpu_custom_call.1
= control target key start
LH: loop header
LB: loop body
LE: loop exit
PB: predicated region body
PF: predicated region fallthrough
CT: control target
= control target key end

     0   :  { %6 = vsyncpa [#allocation3], 0  ;;  %s169_s0 = inlined_call_operand.hbm [shape: f32[2,4,16], index: 0, kind: input, shape index: {}]   ;;  %s170_s1 = inlined_call_operand.hbm [shape: f32[2,16], index: 1, kind: output, shape index: {}]  }
   0x1   :  { %7 = vsyncpa [#allocation4], 0  ;;  %s131_s6 = smov [#allocation2]   ;;  %s83_s10 = scalar_lea.hbm %s169_s0, 128 }
   0x2   :  { %s13_s7 = sshll.u32 %s131_s6, 4  ;;  %p84_p0 = scmp.ne.s32.totalorder %s169_s0, %s83_s10  ;;  %s14_s7 = int_to_ptr.vmem [resolvable:$true] %s13_s7 }
   0x3   :  { %p87_p1 = scmp.lt.u32.totalorder %s83_s10, %s169_s0 }
   0x5   :  { %p89_p2 = pnand %p87_p1, %p84_p0 }
   0x7   :  { %92 = shalt.err (!%p89_p2)
}
   0x8   :  { %s93_s15 = scalar_lea.vmem %s14_s7, 128  ;;  %p98_p4 = scmp.lt.s32.totalorder %s14_s7, %s14_s7 }
   0x9   :  { %p94_p3 = scmp.ne.s32.totalorder %s14_s7, %s93_s15  ;;  %p99_p5 = scmp.lt.s32.totalorder %s93_s15, %s93_s15 }
   0xb   :  { %p100_p6 = por %p99_p5, %p98_p4 }
   0xd   :  { %p101_p7 = pnand %p100_p6, %p94_p3 }
   0xf   :  { %104 = shalt.err (!%p101_p7)
}
  0x10   :  { %s132_s16 = smov 64   ;;  %s133_s17 = smov 4  }
  0x11   :  { %19 = dma.hbm_to_vmem [thread:$0]  %s169_s0, 128, %s14_s7, [#allocation3], %s132_s16, %s132_s16, %s133_s17  }
  0x12   :  { %127 = dma.done.wait [#allocation3], 128  }
  0x13   :  { %128 = vsyncadd [#allocation3], 4294967168  ;;  %vm25_vm0 = vcmask 125952   ;;  %v23_v0 = vld [vmem:[#allocation2] sm:$0xf]  ;;  %s134_s20 = smov [#allocation5]  }
  0x14   :  { %v24_v1 = vld [vmem:[#allocation2 + $0x4] sm:$0xf]  ;;  %v26_v2 = vsel %vm25_vm0, %v23_v0, -inf  ;;  %s70_s21 = sshll.u32 %s134_s20, 4  ;;  %vm46_vm1 = vcmask 1041409   ;;  %vm49_vm2 = vcmask 123904   ;;  %s71_s21 = int_to_ptr.vmem [resolvable:$true] %s70_s21 }
  0x15   :  { %v33_v3 = vsel %vm25_vm0, %v24_v1, -inf  ;;  %v27_v4 = vrot.slane %v26_v2, 4  ;;  %s105_s0 = scalar_lea.vmem %s71_s21, 32  ;;  %p110_p9 = scmp.lt.s32.totalorder %s71_s21, %s71_s21 }
  0x16   :  { %v34_v5 = vrot.slane %v33_v3, 4  ;;  %p106_p8 = scmp.ne.s32.totalorder %s71_s21, %s105_s0  ;;  %p111_p10 = scmp.lt.s32.totalorder %s105_s0, %s105_s0 }
  0x17   :  { %v28_v6 = vmax.f32 %v26_v2, %v27_v4 }
  0x18   :  { %v35_v7 = vmax.f32 %v33_v3, %v34_v5  ;;  %p112_p11 = por %p111_p10, %p110_p9 }
  0x19   :  { %v29_v8 = vrot.slane %v28_v6, 2 }
  0x1a   :  { %v36_v9 = vrot.slane %v35_v7, 2  ;;  %p113_p12 = pnand %p112_p11, %p106_p8 }
  0x1b   :  { %v30_v10 = vmax.f32 %v28_v6, %v29_v8 }
  0x1c   :  { %v37_v11 = vmax.f32 %v35_v7, %v36_v9 }
  0x1d   :  { %v31_v12 = vrot.slane %v30_v10, 1 }
  0x1e   :  { %v38_v13 = vrot.slane %v37_v11, 1 }
  0x1f   :  { %v32_v14 = vmax.f32 %v30_v10, %v31_v12 }
  0x20   :  { %v39_v15 = vmax.f32 %v37_v11, %v38_v13 }
  0x22   :  { %v47_v16 = vsel %vm46_vm1, %v39_v15, %v32_v14 }
  0x23   :  { %50 = vst.msk [vmem:[#allocation5] sm:$0x3] %vm49_vm2, %v47_v16 }
  0x24   :  { %116 = shalt.err (!%p113_p12)
}
  0x25   :  { %s117_s24 = scalar_lea.hbm %s170_s1, 32 }
  0x26   :  { %p118_p13 = scmp.ne.s32.totalorder %s170_s1, %s117_s24  ;;  %p121_p0 = scmp.lt.u32.totalorder %s117_s24, %s170_s1 }
  0x28   :  { %p123_p1 = pnand %p121_p0, %p118_p13 }
  0x2a   :  { %126 = shalt.err (!%p123_p1)
}
  0x2b   :  { %73 = dma.vmem_to_hbm [thread:$0]  %s71_s21, 32, %s170_s1, [#allocation4]  }
  0x2c   :  { %129 = dma.done.wait [#allocation4], 32  }
  0x2d   :  { %130 = vsyncadd [#allocation4], 4294967264 }
  0x2e   :  { %77 = vsyncpa [#allocation3], 1 }
  0x2f   :  { %78 = vsyncpa [#allocation4], 1 }

</bundles_post_ra>
